<compile_context>
chip_gen: v7x
topology: tpu7x:2x2x1
jax: 0.10.0
libtpu: 0.0.40
codegen_flags: <defaults>
</compile_context>

<pallas_src>
import functools

import jax
import jax.numpy as jnp
from jax import lax
from jax.experimental import pallas as pl
from jax.experimental.pallas import tpu as pltpu


def _attention_kernel(x_ref, w1_ref, b1_ref, w2_row_ref, ctx_ref, attn_ref,
                      *, t_valid, compute_dtype):
    # x_ref:      (BB, T_pad, H)      batch block
    # w1_ref:     (H, H)              first Linear weight (x @ w1 convention)
    # b1_ref:     (1, H)              first Linear bias
    # w2_row_ref: (1, H)              second Linear weight as a row vector
    # ctx_ref:    (BB, H)             context output
    # attn_ref:   (1, BB*T_pad)       lane-dense attention-weight output
    bb, t_pad, h = x_ref.shape

    # ---- scores: Linear(H,H) -> tanh -> Linear(H,1) ------------------------
    # Fold batch into the MXU M dim.  T_pad % 8 == 0 makes this reshape a free
    # re-view (no relayout copy).
    x2d = x_ref[...].reshape(bb * t_pad, h)
    hid = jnp.dot(x2d.astype(compute_dtype), w1_ref[...],
                  preferred_element_type=jnp.float32) + b1_ref[...]
    hid = jnp.tanh(hid)                                   # (BB*T_pad, H) f32

    # Linear(H,1) as a VPU multiply + XLU lane reduction (no N=1 MXU matmul).
    # The second Linear's bias is a constant shift of every score and cancels
    # under softmax, so it is dropped entirely.
    hid3 = hid.reshape(bb, t_pad, h)
    s = jnp.sum(hid3 * w2_row_ref[...], axis=-1)          # (BB, T_pad), T on lanes

    # ---- softmax over the (lane) sequence axis ------------------------------
    m = jnp.max(s, axis=-1, keepdims=True)                # (BB, 1)
    e = jnp.exp(s - m)                                    # (BB, T_pad)
    if t_valid < t_pad:                                   # static; mask padded T
        lane = lax.broadcasted_iota(jnp.int32, (bb, t_pad), 1)
        e = jnp.where(lane < t_valid, e, 0.0)
    denom = jnp.sum(e, axis=-1, keepdims=True)            # (BB, 1)
    inv = pl.reciprocal(denom, approx=True)               # EUP vrcp (free slot)
    inv = inv * (2.0 - denom * inv)                       # one Newton step
    w = e * inv                                           # (BB, T_pad)

    # Lane-dense store of the attention weights: one wide row per grid step.
    attn_ref[...] = w.reshape(1, bb * t_pad)

    # ---- context = sum_T(weights * x) ---------------------------------------
    # Re-read x (VMEM reloads are cheap; keeps live ranges short) and contract
    # over T with a batched matmul so the reduction runs on the MXU and the
    # lane/sublane alignment is handled by the compiler (padded T contributes
    # zero: both w and x are zero there).
    x_again = x_ref[...].astype(jnp.float32)              # (BB, T_pad, H)
    ctx = jnp.einsum('bqt,bth->bqh', w[:, None, :], x_again,
                     preferred_element_type=jnp.float32)[:, 0, :]
    ctx_ref[...] = ctx.astype(ctx_ref.dtype)


def _pick_block_b(batch, seq_pad, hidden, *, target_m=256,
                  x_block_budget_bytes=4 << 20):
    """Batch rows folded per grid step.

    Targets BB*T_pad ~ target_m rows for the folded MXU matmul (256 suits
    v6e/v7x's 2x256^2 MXU; v5e is already full at 128), caps the x block at a
    VMEM budget, always returns a divisor of `batch`, and prefers >= 2 grid
    steps so v7x's second TensorCore gets work when the batch is big enough.
    """
    bytes_per_row = seq_pad * hidden * 4
    cap = max(1, x_block_budget_bytes // bytes_per_row)
    want = max(1, -(-target_m // seq_pad))                # ceil(target_m / seq_pad)
    limit = max(1, min(batch, want, cap))
    bb = 1
    for d in range(limit, 0, -1):                         # largest divisor <= limit
        if batch % d == 0:
            bb = d
            break
    if bb == batch and batch % 2 == 0 and (batch // 2) * seq_pad >= 128:
        bb = batch // 2                                    # keep >= 2 grid steps
    return bb


def attention_layer(x, w1, b1, w2, b2=None, *, block_b=None,
                    compute_dtype=jnp.float32):
    """Pallas-TPU forward of AttentionLayer.

    x:  (B, T, H) float32
    w1: (H, H)  first Linear weight, pre-transposed for the x @ w1 convention
    b1: (H,)    first Linear bias
    w2: (H, 1) or (H,)  second Linear weight
    b2: ignored (constant score shift cancels under softmax)

    Returns (context (B, H), attention_weights (B, T, 1)).
    On v6e/v7x pass compute_dtype=jnp.bfloat16 for the MXU matmul path.
    """
    B, T, H = x.shape
    T_pad = ((T + 7) // 8) * 8
    x_in = jnp.pad(x, ((0, 0), (0, T_pad - T), (0, 0))) if T_pad != T else x

    if block_b is None:
        block_b = _pick_block_b(B, T_pad, H)
    assert B % block_b == 0, f"block_b={block_b} must divide batch={B}"
    num_blocks = B // block_b

    w1_c = w1.astype(compute_dtype)
    b1_2d = b1.reshape(1, H).astype(jnp.float32)
    w2_row = w2.reshape(1, H).astype(jnp.float32)

    # Explicit scoped-VMEM limit: double-buffered x block + resident weights +
    # double-buffered outputs + headroom for in-kernel temporaries (capped at
    # v7x's 64 MiB physical VMEM).
    x_blk = block_b * T_pad * H * 4
    w_res = 2 * H * H * jnp.dtype(compute_dtype).itemsize + 4 * H * 4
    out_blk = 2 * (block_b * H * 4 + block_b * T_pad * 4)
    vmem_limit = int(min(64 << 20, max(16 << 20,
                                       4 * x_blk + w_res + out_blk + (2 << 20))))

    kernel = functools.partial(_attention_kernel, t_valid=T,
                               compute_dtype=compute_dtype)

    ctx, attn_flat = pl.pallas_call(
        kernel,
        out_shape=(
            jax.ShapeDtypeStruct((B, H), jnp.float32),
            jax.ShapeDtypeStruct((num_blocks, block_b * T_pad), jnp.float32),
        ),
        grid=(num_blocks,),
        in_specs=[
            pl.BlockSpec((block_b, T_pad, H), lambda b: (b, 0, 0)),  # x block
            pl.BlockSpec((H, H), lambda b: (0, 0)),                  # w1 (resident)
            pl.BlockSpec((1, H), lambda b: (0, 0)),                  # b1 (resident)
            pl.BlockSpec((1, H), lambda b: (0, 0)),                  # w2 row (resident)
        ],
        out_specs=(
            pl.BlockSpec((block_b, H), lambda b: (b, 0)),            # context
            pl.BlockSpec((1, block_b * T_pad), lambda b: (b, 0)),    # attn (lane-dense)
        ),
        compiler_params=pltpu.CompilerParams(
            dimension_semantics=("parallel",),
            vmem_limit_bytes=vmem_limit,
        ),
    )(x_in, w1_c, b1_2d, w2_row)

    attn = attn_flat.reshape(B, T_pad)[:, :T].reshape(B, T, 1)
    return ctx, attn


def reference(x, w1, b1, w2, b2):
    # Pure-JAX reference matching the PyTorch forward.
    s = jnp.tanh(x @ w1 + b1) @ w2 + b2          # (B, T, 1)
    a = jax.nn.softmax(s, axis=1)                # (B, T, 1)
    ctx = jnp.sum(a * x, axis=1)                 # (B, H)
    return ctx, a


if __name__ == "__main__":
    B, T, H = 2, 8, 32

    key = jax.random.PRNGKey(0)
    kx, k1, k2, k3, k4 = jax.random.split(key, 5)

    x = jax.random.normal(kx, (B, T, H), dtype=jnp.float32)

    # PyTorch Linear stores weight as (out, in); pass the x @ W transposed form.
    w1 = jax.random.normal(k1, (H, H), dtype=jnp.float32) * (1.0 / jnp.sqrt(H))
    b1 = jax.random.normal(k2, (H,), dtype=jnp.float32) * 0.01
    w2 = jax.random.normal(k3, (H, 1), dtype=jnp.float32) * (1.0 / jnp.sqrt(H))
    b2 = jax.random.normal(k4, (1,), dtype=jnp.float32) * 0.01

    ctx, attn = attention_layer(x, w1, b1, w2, b2)
    jax.block_until_ready((ctx, attn))

    ctx_ref, attn_ref = reference(x, w1, b1, w2, b2)
    assert ctx.shape == (B, H) and attn.shape == (B, T, 1)
    assert jnp.allclose(ctx, ctx_ref, atol=1e-4, rtol=1e-4), "context mismatch"
    assert jnp.allclose(attn, attn_ref, atol=1e-4, rtol=1e-4), "attention mismatch"

    print("KERNEL_OK")
</pallas_src>

<mosaic_0001>
module attributes {stable_mosaic.version = 11 : i64} {
  func.func @_attention_kernel(%arg0: i32, %arg1: memref<2x8x32xf32, #tpu.memory_space<vmem>>, %arg2: memref<32x32xf32, #tpu.memory_space<vmem>>, %arg3: memref<1x32xf32, #tpu.memory_space<vmem>>, %arg4: memref<1x32xf32, #tpu.memory_space<vmem>>, %arg5: memref<2x32xf32, #tpu.memory_space<vmem>>, %arg6: memref<1x16xf32, #tpu.memory_space<vmem>>) attributes {dimension_semantics = [#tpu.dimension_semantics<parallel>], iteration_bounds = array<i64: 1>, scalar_prefetch = 0 : i64, scratch_operands = 0 : i64, tpu.core_type = #tpu.core_type<tc>, window_params = [{transform_indices = @transform_0, window_bounds = array<i64: 2, 8, 32>}, {pipeline_mode = #tpu.pipeline_mode<synchronous>, transform_indices = @transform_1, window_bounds = array<i64: 32, 32>}, {pipeline_mode = #tpu.pipeline_mode<synchronous>, transform_indices = @transform_2, window_bounds = array<i64: 1, 32>}, {pipeline_mode = #tpu.pipeline_mode<synchronous>, transform_indices = @transform_3, window_bounds = array<i64: 1, 32>}, {transform_indices = @transform_4, window_bounds = array<i64: 2, 32>}, {transform_indices = @transform_5, window_bounds = array<i64: 1, 16>}]} {
    %c0 = arith.constant 0 : index
    %c0_0 = arith.constant 0 : index
    %c0_1 = arith.constant 0 : index
    %0 = vector.load %arg1[%c0, %c0_0, %c0_1] : memref<2x8x32xf32, #tpu.memory_space<vmem>>, vector<2x8x32xf32>
    %1 = vector.shape_cast %0 : vector<2x8x32xf32> to vector<16x32xf32>
    %c0_2 = arith.constant 0 : index
    %c0_3 = arith.constant 0 : index
    %2 = vector.load %arg2[%c0_2, %c0_3] : memref<32x32xf32, #tpu.memory_space<vmem>>, vector<32x32xf32>
    %cst = arith.constant dense<0.000000e+00> : vector<16x32xf32>
    %3 = tpu.matmul %1, %2, %cst {dimension_numbers = #tpu.dot_dimension_numbers<[1], [0], [0], [1], [0, 0, 1, 1], [], []>} : vector<16x32xf32>, vector<32x32xf32>, vector<16x32xf32> -> vector<16x32xf32>
    %c0_4 = arith.constant 0 : index
    %c0_5 = arith.constant 0 : index
    %4 = vector.load %arg3[%c0_4, %c0_5] : memref<1x32xf32, #tpu.memory_space<vmem>>, vector<1x32xf32>
    %5 = vector.broadcast %4 : vector<1x32xf32> to vector<16x32xf32>
    %6 = arith.addf %3, %5 : vector<16x32xf32>
    %7 = math.tanh %6 : vector<16x32xf32>
    %8 = vector.shape_cast %7 : vector<16x32xf32> to vector<2x8x32xf32>
    %c0_6 = arith.constant 0 : index
    %c0_7 = arith.constant 0 : index
    %9 = vector.load %arg4[%c0_6, %c0_7] : memref<1x32xf32, #tpu.memory_space<vmem>>, vector<1x32xf32>
    %10 = vector.shape_cast %9 : vector<1x32xf32> to vector<1x1x32xf32>
    %11 = vector.broadcast %10 : vector<1x1x32xf32> to vector<2x8x32xf32>
    %12 = arith.mulf %8, %11 : vector<2x8x32xf32>
    %cst_8 = arith.constant dense<0.000000e+00> : vector<2x8xf32>
    %13 = vector.multi_reduction <add>, %12, %cst_8 [2] : vector<2x8x32xf32> to vector<2x8xf32>
    %cst_9 = arith.constant dense<0xFF800000> : vector<2xf32>
    %14 = vector.multi_reduction <maximumf>, %13, %cst_9 [1] : vector<2x8xf32> to vector<2xf32>
    %15 = vector.shape_cast %14 : vector<2xf32> to vector<2x1xf32>
    %16 = vector.broadcast %15 : vector<2x1xf32> to vector<2x8xf32>
    %17 = arith.subf %13, %16 : vector<2x8xf32>
    %18 = math.exp %17 : vector<2x8xf32>
    %cst_10 = arith.constant dense<0.000000e+00> : vector<2xf32>
    %19 = vector.multi_reduction <add>, %18, %cst_10 [1] : vector<2x8xf32> to vector<2xf32>
    %20 = vector.shape_cast %19 : vector<2xf32> to vector<2x1xf32>
    %21 = tpu.reciprocal %20 {approx = true} : vector<2x1xf32> -> vector<2x1xf32>
    %22 = arith.mulf %20, %21 : vector<2x1xf32>
    %cst_11 = arith.constant 2.000000e+00 : f32
    %23 = vector.broadcast %cst_11 : f32 to vector<2x1xf32>
    %24 = arith.subf %23, %22 : vector<2x1xf32>
    %25 = arith.mulf %21, %24 : vector<2x1xf32>
    %26 = vector.broadcast %25 : vector<2x1xf32> to vector<2x8xf32>
    %27 = arith.mulf %18, %26 : vector<2x8xf32>
    %28 = vector.shape_cast %27 : vector<2x8xf32> to vector<1x16xf32>
    %c0_12 = arith.constant 0 : index
    %c0_13 = arith.constant 0 : index
    %29 = vector.load %arg6[%c0_12, %c0_13] : memref<1x16xf32, #tpu.memory_space<vmem>>, vector<1x16xf32>
    tpu.vector_store %arg6[%c0_12, %c0_13], %28 {strides = array<i32>} : memref<1x16xf32, #tpu.memory_space<vmem>>, vector<1x16xf32>,
    %c0_14 = arith.constant 0 : index
    %c0_15 = arith.constant 0 : index
    %c0_16 = arith.constant 0 : index
    %30 = vector.load %arg1[%c0_14, %c0_15, %c0_16] : memref<2x8x32xf32, #tpu.memory_space<vmem>>, vector<2x8x32xf32>
    %31 = vector.shape_cast %27 : vector<2x8xf32> to vector<2x1x8xf32>
    "tpu.trace_start"() <{level = 10 : i32, message = "bqt,bth->bqh"}> : () -> ()
    %cst_17 = arith.constant dense<0.000000e+00> : vector<2x1x32xf32>
    %32 = tpu.matmul %31, %30, %cst_17 {dimension_numbers = #tpu.dot_dimension_numbers<[2], [1], [1], [2], [0, 0, 0, 1, 1, 2], [0], [0]>} : vector<2x1x8xf32>, vector<2x8x32xf32>, vector<2x1x32xf32> -> vector<2x1x32xf32>
    "tpu.trace_stop"() : () -> ()
    %33 = vector.shape_cast %32 : vector<2x1x32xf32> to vector<2x32xf32>
    %c0_18 = arith.constant 0 : index
    %c0_19 = arith.constant 0 : index
    %34 = vector.load %arg5[%c0_18, %c0_19] : memref<2x32xf32, #tpu.memory_space<vmem>>, vector<2x32xf32>
    tpu.vector_store %arg5[%c0_18, %c0_19], %33 {strides = array<i32>} : memref<2x32xf32, #tpu.memory_space<vmem>>, vector<2x32xf32>,
    return
  }
  func.func @transform_0(%arg0: i32) -> (i32, i32, i32) {
    %c0_i32 = arith.constant 0 : i32
    %c0_i32_0 = arith.constant 0 : i32
    %c0_i32_1 = arith.constant 0 : i32
    return %arg0, %c0_i32, %c0_i32_0 : i32, i32, i32
  }
  func.func @transform_1(%arg0: i32) -> (i32, i32) {
    %c0_i32 = arith.constant 0 : i32
    %c0_i32_0 = arith.constant 0 : i32
    %c0_i32_1 = arith.constant 0 : i32
    return %c0_i32, %c0_i32_0 : i32, i32
  }
  func.func @transform_2(%arg0: i32) -> (i32, i32) {
    %c0_i32 = arith.constant 0 : i32
    %c0_i32_0 = arith.constant 0 : i32
    %c0_i32_1 = arith.constant 0 : i32
    return %c0_i32, %c0_i32_0 : i32, i32
  }
  func.func @transform_3(%arg0: i32) -> (i32, i32) {
    %c0_i32 = arith.constant 0 : i32
    %c0_i32_0 = arith.constant 0 : i32
    %c0_i32_1 = arith.constant 0 : i32
    return %c0_i32, %c0_i32_0 : i32, i32
  }
  func.func @transform_4(%arg0: i32) -> (i32, i32) {
    %c0_i32 = arith.constant 0 : i32
    %c0_i32_0 = arith.constant 0 : i32
    return %arg0, %c0_i32 : i32, i32
  }
  func.func @transform_5(%arg0: i32) -> (i32, i32) {
    %c0_i32 = arith.constant 0 : i32
    %c0_i32_0 = arith.constant 0 : i32
    return %arg0, %c0_i32 : i32, i32
  }
}

</mosaic_0001>

<bundles_post_ra>
// kernel: tpu_custom_call.1
= control target key start
LH: loop header
LB: loop body
LE: loop exit
PB: predicated region body
PF: predicated region fallthrough
CT: control target
= control target key end

     0   :  { %11 = vsyncpa [#allocation3], 0  ;;  %s731_s0 = inlined_call_operand.hbm [shape: f32[2,8,32], index: 0, kind: input, shape index: {}]   ;;  %s732_s1 = inlined_call_operand.hbm [shape: f32[32,32], index: 1, kind: input, shape index: {}]   ;;  %s733_s2 = inlined_call_operand.vmem [shape: f32[1,32], index: 2, kind: input, shape index: {}]   ;;  %s734_s3 = inlined_call_operand.vmem [shape: f32[1,32], index: 3, kind: input, shape index: {}]   ;;  %s735_s4 = inlined_call_operand.hbm [shape: f32[2,32], index: 4, kind: output, shape index: {0}]   ;;  %s736_s5 = inlined_call_operand.hbm [shape: f32[1,16], index: 5, kind: output, shape index: {1}]  }
   0x1   :  { %12 = vsyncpa [#allocation6], 0 }
   0x2   :  { %13 = vsyncpa [#allocation4], 0 }
   0x3   :  { %14 = vsyncpa [#allocation9], 0  ;;  %s607_s18 = smov [#allocation2]   ;;  %s511_s22 = scalar_lea.hbm %s731_s0, 256 }
   0x4   :  { %s20_s19 = sshll.u32 %s607_s18, 4  ;;  %p512_p0 = scmp.ne.s32.totalorder %s731_s0, %s511_s22  ;;  %s21_s19 = int_to_ptr.vmem [resolvable:$true] %s20_s19 }
   0x5   :  { %p515_p1 = scmp.lt.u32.totalorder %s511_s22, %s731_s0 }
   0x7   :  { %p517_p2 = pnand %p515_p1, %p512_p0 }
   0x9   :  { %520 = shalt.err (!%p517_p2)
}
   0xa   :  { %s521_s27 = scalar_lea.vmem %s21_s19, 256  ;;  %p526_p4 = scmp.lt.s32.totalorder %s21_s19, %s21_s19 }
   0xb   :  { %p522_p3 = scmp.ne.s32.totalorder %s21_s19, %s521_s27  ;;  %p527_p5 = scmp.lt.s32.totalorder %s521_s27, %s521_s27 }
   0xd   :  { %p528_p6 = por %p527_p5, %p526_p4 }
   0xf   :  { %p529_p7 = pnand %p528_p6, %p522_p3 }
  0x11   :  { %532 = shalt.err (!%p529_p7)
}
  0x12   :  { %s608_s28 = smov 128   ;;  %s609_s29 = smov 8  }
  0x13   :  { %26 = dma.hbm_to_vmem [thread:$0]  %s731_s0, 256, %s21_s19, [#allocation3], %s608_s28, %s608_s28, %s609_s29  }
  0x14   :  { %s610_s7 = smov [#allocation5]   ;;  %s533_s11 = scalar_lea.hbm %s732_s1, 512 }
  0x15   :  { %s32_s8 = sshll.u32 %s610_s7, 4  ;;  %p534_p8 = scmp.ne.s32.totalorder %s732_s1, %s533_s11  ;;  %s33_s8 = int_to_ptr.vmem [resolvable:$true] %s32_s8 }
  0x16   :  { %p537_p9 = scmp.lt.u32.totalorder %s533_s11, %s732_s1 }
  0x18   :  { %p539_p10 = pnand %p537_p9, %p534_p8 }
  0x1a   :  { %542 = shalt.err (!%p539_p10)
}
  0x1b   :  { %s543_s16 = scalar_lea.vmem %s33_s8, 512  ;;  %p548_p12 = scmp.lt.s32.totalorder %s33_s8, %s33_s8 }
  0x1c   :  { %p544_p11 = scmp.ne.s32.totalorder %s33_s8, %s543_s16  ;;  %p549_p13 = scmp.lt.s32.totalorder %s543_s16, %s543_s16 }
  0x1e   :  { %p550_p0 = por %p549_p13, %p548_p12 }
  0x20   :  { %p551_p1 = pnand %p550_p0, %p544_p11 }
  0x22   :  { %554 = shalt.err (!%p551_p1)
}
  0x23   :  { %38 = dma.hbm_to_vmem [thread:$0]  %s732_s1, 512, %s33_s8, [#allocation6], %s608_s28, %s608_s28, %s609_s29  }
  0x24   :  { %599 = dma.done.wait [#allocation3], 256  }
  0x25   :  { %600 = vsyncadd [#allocation3], 4294967040 }
  0x26   :  { %601 = dma.done.wait [#allocation6], 512  }
  0x27   :  { %602 = vsyncadd [#allocation6], 4294966784  ;;  %vm62_vm0 = vcmask 261120   ;;  %v51_v0 = vld [vmem:[#allocation5] sm:$0xff]  ;;  %v52_v1 = vld [vmem:[#allocation5 + $0x8] sm:$0xff]  ;;  %v163_v20 = vlaneseq  ;;  %vm173_vm1 = vcmask 1041409  }
  0x28   :  { %v53_v2 = vld [vmem:[#allocation5 + $0x10] sm:$0xff]  ;;  %v482_v3 = vpack.c.bf16 %v52_v1, %v51_v0  ;;  %v54_v4 = vld [vmem:[#allocation5 + $0x18] sm:$0xff]  ;;  %vm176_vm2 = vcmask 58368   ;;  %v611_v30 = vmov 0   ;;  %v612_v48 = vmov 0.0  }
  0x29   :  { %v670_v5 = vld [vmem:[#allocation2] sm:$0xff]  ;;  %v486_v6 = vpack.c.bf16 %v54_v4, %v53_v2  ;;  %v674_v7 = vld [vmem:[#allocation2 + $0x8] sm:$0xff]  ;;  %v164_v21 = vand.u32 127, %v163_v20  ;;  %v686_v22 = vshrl.u32 %v163_v20, 7  ;;  %500 = vset.pattern.permute.xlu0 %v611_v30  ;;  %499 = vset.pattern.permute.xlu1 %v611_v30  ;;  %vm613_vm3 = vmmov 0  }
  0x2a   :  { %469 = vmatprep.mubr.msk.f32.mxu0 %vm62_vm0, %v670_v5  ;;  %483 = vmatprep.subr.bf16.mxu0 %v482_v3  ;;  %v445_v8 = vld [vmem:[%s733_s2] ss:$0 sm:$0xff]  ;;  %vm259_vm4 = vcmask 64512   ;;  %vm252_vm5 = vcmask 130112   ;;  %vm255_vm6 = vcmask 122880   ;;  %s614_s2 = smov [#allocation8]  }
  0x2b   :  { %485 = vmatpush3.bf16.msra.mxu0 %v482_v3  ;;  %v448_v13 = vld [vmem:[%s734_s3] ss:$0 sm:$0xff]  ;;  %v689_v24 = vsub.s32 %v164_v21, %v686_v22  ;;  %v183_v31 = vsub.s32 0, %v686_v22  ;;  %v187_v32 = vsub.s32 1, %v686_v22  ;;  %472 = vmatprep.subr.mxu1 %v612_v48  ;;  %v247_v58 = vadd.s32 4294967288, %v164_v21  ;;  %s431_s3 = sshll.u32 %s614_s2, 4  ;;  %s432_s3 = int_to_ptr.vmem [resolvable:$true] %s431_s3 }
  0x2c   :  { %487 = vmatprep.subr.bf16.mxu0 %v486_v6  ;;  %473 = vmatpush3.msra.mxu1 %v670_v5  ;;  %s555_s21 = scalar_lea.vmem %s432_s3, 16  ;;  %s559_s22 = scalar_lea.vmem %s432_s3, 32 }
  0x2d   :  { %477 = vmatprep.subr.mxu1 %v612_v48  ;;  %474 = vmatprep.mubr.msk.f32.mxu1 %vm613_vm3, %v612_v48  ;;  %v250_v61 = vsub.s32 %v247_v58, %v686_v22  ;;  %p556_p2 = scmp.ne.s32.totalorder %s432_s3, %s555_s21  ;;  %p560_p3 = scmp.lt.s32.totalorder %s432_s3, %s432_s3 }
  0x2e   :  { %p561_p4 = scmp.lt.s32.totalorder %s559_s22, %s555_s21 }
  0x2f   :  { %489 = vmatpush3.bf16.msra.mxu0 %v486_v6 }
  0x30   :  { %p562_p5 = por %p561_p4, %p560_p3 }
  0x32   :  { %470 = vmatmul.mubr.msk.f32.vlgmr.msra.gmra.mrb[0].mxu0 %vm62_vm0, %v674_v7  ;;  %p563_p6 = pnand %p562_p5, %p556_p2 }
 0x105   :  { %v471_v9 = vpop.f32.mrb[0].mxu0 }
 0x106   :  { %v141_v10 = vadd.f32 %v471_v9, %v445_v8  ;;  %v135_v11 = vpop.f32.mrb[1].mxu0 }
 0x107   :  { %v136_v12 = vadd.f32 %v445_v8, %v135_v11 }
 0x108   :  { %501 = vtanh.f32 %v141_v10 }
 0x109   :  { %503 = vtanh.f32 %v136_v12 }
 0x112   :  { %v502_v14 = vpop.eup %501 }
 0x113   :  { %v504_v15 = vpop.eup %503  ;;  %v154_v18 = vmul.f32 %v502_v14, %v448_v13 }
 0x114   :  { %v153_v16 = vmul.f32 %v504_v15, %v448_v13 }
 0x115   :  { %v158_v19 = vsel %vm62_vm0, %v154_v18, 0.0 }
 0x116   :  { %v155_v17 = vsel %vm62_vm0, %v153_v16, 0.0 }
 0x117   :  { %156 = vadd.xlane.f32.xlu0 %v155_v17 }
 0x11b   :  { %159 = vadd.xlane.f32.xlu0 %v158_v19 }
 0x1a4   :  { %v157_v23 = vpop.xlane.xlu0 %156 }
 0x1a5   :  { %v168_v26 = vrot.slane %v157_v23, %v689_v24 }
 0x1a8   :  { %v160_v25 = vpop.xlane.xlu0 %159 }
 0x1a9   :  { %v172_v27 = vrot.slane %v160_v25, %v689_v24 }
 0x1ab   :  { %v174_v28 = vsel %vm173_vm1, %v172_v27, %v168_v26 }
 0x1ac   :  { %v177_v29 = vsel %vm176_vm2, %v174_v28, -inf }
 0x1ad   :  { %178 = vmax.xlane.f32.xlu1 %v177_v29 }
 0x23a   :  { %v179_v33 = vpop.xlane.xlu1 %178 }
 0x23b   :  { %v184_v34 = vrot.slane %v179_v33, %v183_v31  ;;  %v188_v35 = vrot.slane %v179_v33, %v187_v32 }
 0x23d   :  { %v191_v36 = vsub.f32 %v157_v23, %v184_v34  ;;  %v192_v37 = vsub.f32 %v160_v25, %v188_v35 }
 0x23f   :  { %v193_v38 = vmul.f32 1.442695, %v191_v36  ;;  %v195_v39 = vmul.f32 1.442695, %v192_v37 }
 0x241   :  { %505 = vpow2.f32 %v193_v38 }
 0x242   :  { %507 = vpow2.f32 %v195_v39 }
 0x24b   :  { %v506_v40 = vpop.eup %505 }
 0x24c   :  { %v508_v41 = vpop.eup %507  ;;  %200 = vperm.xlu1 %499, %v506_v40  }
 0x24d   :  { %203 = vperm.xlu0 %500, %v508_v41  }
 0x2cb   :  { %v201_v42 = vpop.permute.xlu1 %200 }
 0x2cc   :  { %v204_v43 = vpop.permute.xlu0 %203  ;;  %v208_v44 = vrot.slane %v201_v42, %v689_v24 }
 0x2cd   :  { %v212_v45 = vrot.slane %v204_v43, %v689_v24 }
 0x2cf   :  { %v213_v46 = vsel %vm173_vm1, %v212_v45, %v208_v44 }
 0x2d0   :  { %v215_v47 = vsel %vm176_vm2, %v213_v46, 0.0 }
 0x2d1   :  { %216 = vadd.xlane.f32.xlu1 %v215_v47 }
 0x35e   :  { %v217_v49 = vpop.xlane.xlu1 %216 }
 0x35f   :  { %509 = vrcp.f32 %v217_v49 }
 0x369   :  { %v510_v50 = vpop.eup %509 }
 0x36a   :  { %v219_v51 = vmul.f32 %v510_v50, %v217_v49 }
 0x36c   :  { %v220_v52 = vsub.f32 2.0, %v219_v51 }
 0x36e   :  { %v221_v53 = vmul.f32 %v510_v50, %v220_v52 }
 0x370   :  { %v226_v54 = vrot.slane %v221_v53, %v183_v31  ;;  %v230_v55 = vrot.slane %v221_v53, %v187_v32 }
 0x372   :  { %v233_v56 = vmul.f32 %v506_v40, %v226_v54  ;;  %v234_v57 = vmul.f32 %v508_v41, %v230_v55 }
 0x374   :  { %238 = vperm.xlu0 %500, %v233_v56  }
 0x378   :  { %241 = vperm.xlu0 %500, %v234_v57  }
 0x3f3   :  { %v239_v59 = vpop.permute.xlu0 %238 }
 0x3f4   :  { %v246_v60 = vrot.slane %v239_v59, %v689_v24 }
 0x3f6   :  { %475 = vmatmul.mubr.msk.f32.vlgmr.msra.gmra.mrb[0].mxu1 %vm259_vm4, %v246_v60 }
 0x3f7   :  { %478 = vmatpush3.msra.mxu1 %v674_v7  ;;  %v242_v62 = vpop.permute.xlu0 %241  ;;  %479 = vmatprep.mubr.msk.f32.mxu1 %vm613_vm3, %v612_v48 }
 0x3f8   :  { %v251_v63 = vrot.slane %v242_v62, %v250_v61  ;;  %v335_v0 = vrot.slane %v242_v62, %v689_v24 }
 0x3fa   :  { %480 = vmatmul.mubr.msk.f32.vlgmr.msra.gmra.mrb[2].mxu1 %vm259_vm4, %v335_v0  ;;  %v253_v1 = vsel %vm252_vm5, %v251_v63, %v246_v60 }
 0x3fb   :  { %256 = vst.msk [vmem:[#allocation8] sm:$0x1] %vm255_vm6, %v253_v1 }
 0x3fc   :  { %566 = shalt.err (!%p563_p6)
}
 0x3fd   :  { %s567_s25 = scalar_lea.hbm %s736_s5, 16 }
 0x3fe   :  { %p568_p7 = scmp.ne.s32.totalorder %s736_s5, %s567_s25  ;;  %p571_p8 = scmp.lt.u32.totalorder %s567_s25, %s736_s5 }
 0x400   :  { %p573_p9 = pnand %p571_p8, %p568_p7 }
 0x402   :  { %576 = shalt.err (!%p573_p9)
}
 0x403   :  { %434 = dma.vmem_to_hbm [thread:$0]  %s432_s3, 16, %s736_s5, [#allocation9]   ;;  %vm413_vm7 = vcmask 254976  }
 0x404   :  { %s615_s7 = smov [#allocation7]  }
 0x405   :  { %s421_s8 = sshll.u32 %s615_s7, 4  ;;  %s422_s8 = int_to_ptr.vmem [resolvable:$true] %s421_s8 }
 0x406   :  { %s577_s9 = scalar_lea.vmem %s422_s8, 32  ;;  %p582_p11 = scmp.lt.s32.totalorder %s422_s8, %s422_s8 }
 0x407   :  { %p578_p10 = scmp.ne.s32.totalorder %s422_s8, %s577_s9  ;;  %p583_p12 = scmp.lt.s32.totalorder %s577_s9, %s577_s9 }
 0x409   :  { %p584_p13 = por %p583_p12, %p582_p11 }
 0x40b   :  { %p585_p0 = pnand %p584_p13, %p578_p10 }
 0x4c9   :  { %v328_v2 = vpop.f32.mrb[0].mxu1 }
 0x4ca   :  { %v476_v3 = vpop.f32.mrb[1].mxu1 }
 0x4cd   :  { %v404_v4 = vpop.f32.mrb[2].mxu1 }
 0x4ce   :  { %v410_v5 = vrot.slane %v404_v4, 7  ;;  %v481_v6 = vpop.f32.mrb[3].mxu1 }
 0x4d0   :  { %v411_v7 = vsel %vm173_vm1, %v410_v5, %v328_v2 }
 0x4d1   :  { %414 = vst.msk [vmem:[#allocation7] sm:$0x3] %vm413_vm7, %v411_v7 }
 0x4d2   :  { %588 = shalt.err (!%p585_p0)
}
 0x4d3   :  { %s589_s11 = scalar_lea.hbm %s735_s4, 32 }
 0x4d4   :  { %p590_p1 = scmp.ne.s32.totalorder %s735_s4, %s589_s11  ;;  %p593_p2 = scmp.lt.u32.totalorder %s589_s11, %s735_s4 }
 0x4d6   :  { %p595_p3 = pnand %p593_p2, %p590_p1 }
 0x4d8   :  { %598 = shalt.err (!%p595_p3)
}
 0x4d9   :  { %424 = dma.vmem_to_hbm [thread:$0]  %s422_s8, 32, %s735_s4, [#allocation4]  }
 0x4da   :  { %603 = dma.done.wait [#allocation4], 32  }
 0x4db   :  { %604 = vsyncadd [#allocation4], 4294967264 }
 0x4dc   :  { %605 = dma.done.wait [#allocation9], 16  }
 0x4dd   :  { %606 = vsyncadd [#allocation9], 4294967280 }
 0x4de   :  { %441 = vsyncpa [#allocation3], 1 }
 0x4df   :  { %442 = vsyncpa [#allocation6], 1 }
 0x4e0   :  { %443 = vsyncpa [#allocation4], 1 }
 0x4e1   :  { %444 = vsyncpa [#allocation9], 1 }

</bundles_post_ra>
